<compile_context>
chip_gen: v5e
topology: v5e:2x2
jax: 0.10.0
libtpu: 0.0.40
codegen_flags: <defaults>
</compile_context>

<pallas_src>
import functools
import math

import jax
import jax.numpy as jnp
from jax.experimental import pallas as pl
from jax.experimental.pallas import tpu as pltpu


def _adaln_kernel(x_ref, c_ref, bias_ref, wf_ref, bf_ref, out_ref, *,
                  components, component_major_out):
    # x_ref   : (Bt, Sq, D)        queries (model dtype)
    # c_ref   : (Bt, Sk, D)        conditioning, used as both K and V
    # bias_ref: (Bt*Sq, Bt*Sk) f32 additive block-diagonal mask (0 / -1e30)
    # wf_ref  : (D, C*D)           fused (out-proj @ modulator) weight
    # bf_ref  : (1, C*D) f32       fused bias
    # out_ref : (Bt, Sq, C*D)  or  (C, Bt, Sq, D)
    x = x_ref[...]
    c = c_ref[...]
    bt, sq, d = x.shape
    sk = c.shape[1]

    xr = x.reshape(bt * sq, d)          # 8-aligned rows -> layout no-op
    cr = c.reshape(bt * sk, d)

    # ---- block-diagonal single-pass attention (q = x, k = v = conditioning) ----
    # One full-size score matmul + one PV matmul instead of 2*Bt tiny batched
    # matmuls; the additive mask zeroes cross-batch probabilities.
    s = jax.lax.dot_general(xr, cr, (((1,), (1,)), ((), ())),
                            preferred_element_type=jnp.float32)     # (Bt*Sq, Bt*Sk)
    s = s * (1.0 / math.sqrt(d)) + bias_ref[...]
    m = jnp.max(s, axis=-1, keepdims=True)
    p = jnp.exp(s - m)                                               # EUP
    l = jnp.sum(p, axis=-1, keepdims=True)                           # (Bt*Sq, 1)
    attn = jnp.dot(p.astype(c.dtype), cr,
                   preferred_element_type=jnp.float32)               # (Bt*Sq, D) f32
    # Deferred softmax normalisation: exact reciprocal of the (rows, 1) sums,
    # then a broadcast multiply (no approx reciprocal -> exact numerics).
    rows = (attn * (1.0 / l)).astype(x.dtype)                        # (Bt*Sq, D)

    # ---- fused output-projection + modulator: one wide matmul D -> C*D ----
    z = jnp.dot(rows, wf_ref[...],
                preferred_element_type=jnp.float32) + bf_ref[...]    # (Bt*Sq, C*D) f32

    if component_major_out:
        # D % 128 == 0: per-component slices are lane-aligned and free.
        for comp in range(components):
            out_ref[comp] = (z[:, comp * d:(comp + 1) * d]
                             .reshape(bt, sq, d).astype(out_ref.dtype))
    else:
        # D < 128: single lane-dense store of the whole (Bt, Sq, C*D) slab.
        out_ref[...] = z.reshape(bt, sq, components * d).astype(out_ref.dtype)


def _vmem_estimate(bt, sq, sk, d, components, in_itemsize, out_itemsize,
                   weight_bufs):
    rows, keys, cols = bt * sq, bt * sk, components * d
    est = 2 * (bt * sq * d + bt * sk * d) * in_itemsize          # x, c (double buffered)
    est += 2 * rows * cols * out_itemsize                        # output block
    est += weight_bufs * (d * cols * in_itemsize                 # fused weight
                          + cols * 4                             # fused bias (f32)
                          + rows * keys * 4)                     # additive mask (f32)
    est += rows * keys * 4 * 2                                   # scores + probs (f32)
    est += rows * 4 * 2 + rows * d * 4 + rows * d * in_itemsize  # m, l, attn, rows
    est += rows * cols * 4                                       # z (f32)
    return est


def _pick_batch_tile(batch, sq, sk, d, components, in_itemsize, out_itemsize,
                     target_rows=512, vmem_budget=40 * 2 ** 20):
    """Largest divisor of `batch` whose folded tile keeps the flattened matmuls
    MXU-friendly and within the VMEM budget.  No ">=2 grid steps" rule: v5e/v6e
    have a single TensorCore, so extra steps only add ~0.35us pipeline overhead
    (on v7x, prefer >=2 steps only if each half keeps >= target_rows rows)."""
    best, best_aligned = 1, None
    for bt in range(1, batch + 1):
        if batch % bt:
            continue
        if bt * sq > target_rows or bt * sk > target_rows:
            continue
        if _vmem_estimate(bt, sq, sk, d, components, in_itemsize, out_itemsize,
                          weight_bufs=2) > vmem_budget:
            continue
        best = bt
        if (bt * sq) % 8 == 0 and (bt * sk) % 8 == 0:   # free (8,128)-aligned reshapes
            best_aligned = bt
    return best_aligned if best_aligned is not None else best


def adaln_forward(x, conditioning, w_proj, b_proj, w_mod, b_mod,
                  components=6, single_buffer_weights=True):
    """Pallas AdaLN forward. Returns a tuple of `components` arrays (B, Sq, D)."""
    B, Sq, D = x.shape
    Bc, Sk, Dc = conditioning.shape
    assert B == Bc and D == Dc

    f32 = jnp.float32
    hi = jax.lax.Precision.HIGHEST

    # ---- fuse out-projection + modulator (exact f32, HIGHEST precision) ----
    #   z = (attn @ Wp^T + bp) @ Wm^T + bm = attn @ (Wp^T Wm^T) + (bp Wm^T + bm)
    wp_t = jnp.asarray(w_proj, f32).T                                # (D, D)
    wm_t = jnp.asarray(w_mod, f32).T                                 # (D, C*D)
    w_fused = jnp.dot(wp_t, wm_t, precision=hi).astype(x.dtype)      # (D, C*D)
    b_fused = (jnp.dot(jnp.asarray(b_proj, f32), wm_t, precision=hi)
               + jnp.asarray(b_mod, f32)).reshape(1, components * D)  # f32

    itemsize = jnp.dtype(x.dtype).itemsize
    bt = _pick_batch_tile(B, Sq, Sk, D, components, itemsize, itemsize)
    grid = (B // bt,)

    # Additive cross-batch mask for the flattened (block-diagonal) attention.
    q_blk = jnp.arange(bt * Sq) // Sq
    k_blk = jnp.arange(bt * Sk) // Sk
    attn_bias = jnp.where(q_blk[:, None] == k_blk[None, :],
                          jnp.float32(0.0), jnp.float32(-1e30))

    component_major = (D % 128 == 0)
    if component_major:
        out_shape = jax.ShapeDtypeStruct((components, B, Sq, D), x.dtype)
        out_specs = pl.BlockSpec((components, bt, Sq, D), lambda b: (0, b, 0, 0))
    else:
        out_shape = jax.ShapeDtypeStruct((B, Sq, components * D), x.dtype)
        out_specs = pl.BlockSpec((bt, Sq, components * D), lambda b: (b, 0, 0))

    # Grid-invariant inputs: single-buffer them when pipeline_mode is available
    # (halves resident weight VMEM -- matters at large D on v7x's 64 MiB VMEM).
    # NOTE: for very large D (>= ~1.5K bf16) a `components` grid axis streaming
    # one (D, D) slab per step would cut resident weight VMEM by another Cx.
    const_kwargs = dict(pipeline_mode=pl.Buffered(1)) if single_buffer_weights else {}
    bias_spec = pl.BlockSpec((bt * Sq, bt * Sk), lambda b: (0, 0), **const_kwargs)
    w_spec = pl.BlockSpec((D, components * D), lambda b: (0, 0), **const_kwargs)
    b_spec = pl.BlockSpec((1, components * D), lambda b: (0, 0), **const_kwargs)

    est = _vmem_estimate(bt, Sq, Sk, D, components, itemsize, itemsize,
                         weight_bufs=1 if single_buffer_weights else 2)
    vmem_limit = int(min(48 * 2 ** 20, max(16 * 2 ** 20, int(1.5 * est))))

    out = pl.pallas_call(
        functools.partial(_adaln_kernel, components=components,
                          component_major_out=component_major),
        out_shape=out_shape,
        grid_spec=pltpu.PrefetchScalarGridSpec(
            num_scalar_prefetch=0,
            grid=grid,
            in_specs=[
                pl.BlockSpec((bt, Sq, D), lambda b: (b, 0, 0)),   # x (queries)
                pl.BlockSpec((bt, Sk, D), lambda b: (b, 0, 0)),   # conditioning (K=V)
                bias_spec,                                        # block-diag mask
                w_spec,                                           # fused weight
                b_spec,                                           # fused bias
            ],
            out_specs=out_specs,
        ),
        compiler_params=pltpu.CompilerParams(
            dimension_semantics=("parallel",),
            vmem_limit_bytes=vmem_limit),
    )(x, conditioning, attn_bias, w_fused, b_fused)

    if component_major:
        return tuple(out[i] for i in range(components))
    # (B, Sq, C*D) slab: the chunk views mirror torch.chunk(., C, dim=-1).
    return tuple(jnp.split(out, components, axis=-1))


def adaln_reference(x, conditioning, w_proj, b_proj, w_mod, b_mod, components=6):
    """Pure-JAX reference mirroring the PyTorch module (HIGHEST precision)."""
    f32, hi = jnp.float32, jax.lax.Precision.HIGHEST
    d = x.shape[-1]
    xf = x.astype(f32)
    cf = conditioning.astype(f32)
    s = jnp.einsum('bqd,bkd->bqk', xf / jnp.sqrt(f32(d)), cf, precision=hi)
    p = jax.nn.softmax(s, axis=-1)
    attn = jnp.einsum('bqk,bkd->bqd', p, cf, precision=hi)
    y = jnp.einsum('bqd,od->bqo', attn, w_proj.astype(f32), precision=hi) + b_proj
    z = jnp.einsum('bqo,po->bqp', y, w_mod.astype(f32), precision=hi) + b_mod
    return tuple(jnp.split(z, components, axis=-1))


def _linear_init(key, out_features, in_features):
    # Deterministic stand-in for nn.Linear default init (uniform +-1/sqrt(fan_in)).
    kw, kb = jax.random.split(key)
    bound = 1.0 / math.sqrt(in_features)
    w = jax.random.uniform(kw, (out_features, in_features), jnp.float32,
                           minval=-bound, maxval=bound)
    b = jax.random.uniform(kb, (out_features,), jnp.float32,
                           minval=-bound, maxval=bound)
    return w, b


if __name__ == "__main__":
    B, Sq, Sk, D, components = 2, 8, 8, 32, 6

    key = jax.random.PRNGKey(0)
    kx, kc, kp, km = jax.random.split(key, 4)

    x = jax.random.normal(kx, (B, Sq, D), jnp.float32)
    conditioning = jax.random.normal(kc, (B, Sk, D), jnp.float32)

    # MultiHeadDispatch output projection: Linear(D, D)
    w_proj, b_proj = _linear_init(kp, D, D)
    # modulator: Linear(D, D*components)
    w_mod, b_mod = _linear_init(km, D * components, D)

    def _run(single_buffer):
        fn = jax.jit(functools.partial(adaln_forward, components=components,
                                       single_buffer_weights=single_buffer))
        return jax.block_until_ready(
            fn(x, conditioning, w_proj, b_proj, w_mod, b_mod))

    try:
        chunks = _run(True)
    except Exception:
        # pipeline_mode=pl.Buffered(1) not supported by this JAX version ->
        # fall back to default double-buffered weight blocks.
        chunks = _run(False)

    ref_chunks = adaln_reference(x, conditioning, w_proj, b_proj, w_mod, b_mod,
                                 components=components)
    # Tolerance: the MXU may evaluate f32 matmuls with reduced-precision bf16
    # passes depending on generation/compiler defaults; 2e-2 covers that worst
    # case (typical observed error is far smaller; reference is HIGHEST prec).
    for got, want in zip(chunks, ref_chunks):
        assert got.shape == (B, Sq, D)
        assert jnp.allclose(got, want, rtol=2e-2, atol=2e-2), \
            "mismatch vs reference"

    print("KERNEL_OK")
</pallas_src>

<mosaic_0001>
module attributes {stable_mosaic.version = 11 : i64} {
  func.func @_adaln_kernel(%arg0: i32, %arg1: memref<2x8x32xf32, #tpu.memory_space<vmem>>, %arg2: memref<2x8x32xf32, #tpu.memory_space<vmem>>, %arg3: memref<16x16xf32, #tpu.memory_space<vmem>>, %arg4: memref<32x192xf32, #tpu.memory_space<vmem>>, %arg5: memref<1x192xf32, #tpu.memory_space<vmem>>, %arg6: memref<2x8x192xf32, #tpu.memory_space<vmem>>) attributes {dimension_semantics = [#tpu.dimension_semantics<parallel>], iteration_bounds = array<i64: 1>, scalar_prefetch = 0 : i64, scratch_operands = 0 : i64, tpu.core_type = #tpu.core_type<tc>, window_params = [{transform_indices = @transform_0, window_bounds = array<i64: 2, 8, 32>}, {transform_indices = @transform_1, window_bounds = array<i64: 2, 8, 32>}, {pipeline_mode = #tpu.pipeline_mode<synchronous>, transform_indices = @transform_2, window_bounds = array<i64: 16, 16>}, {pipeline_mode = #tpu.pipeline_mode<synchronous>, transform_indices = @transform_3, window_bounds = array<i64: 32, 192>}, {pipeline_mode = #tpu.pipeline_mode<synchronous>, transform_indices = @transform_4, window_bounds = array<i64: 1, 192>}, {transform_indices = @transform_5, window_bounds = array<i64: 2, 8, 192>}]} {
    %c0 = arith.constant 0 : index
    %c0_0 = arith.constant 0 : index
    %c0_1 = arith.constant 0 : index
    %0 = vector.load %arg1[%c0, %c0_0, %c0_1] : memref<2x8x32xf32, #tpu.memory_space<vmem>>, vector<2x8x32xf32>
    %c0_2 = arith.constant 0 : index
    %c0_3 = arith.constant 0 : index
    %c0_4 = arith.constant 0 : index
    %1 = vector.load %arg2[%c0_2, %c0_3, %c0_4] : memref<2x8x32xf32, #tpu.memory_space<vmem>>, vector<2x8x32xf32>
    %2 = vector.shape_cast %0 : vector<2x8x32xf32> to vector<16x32xf32>
    %3 = vector.shape_cast %1 : vector<2x8x32xf32> to vector<16x32xf32>
    %cst = arith.constant dense<0.000000e+00> : vector<16x16xf32>
    %4 = tpu.matmul %2, %3, %cst {dimension_numbers = #tpu.dot_dimension_numbers<[1], [1], [0], [0], [0, 0, 1, 0], [], []>} : vector<16x32xf32>, vector<16x32xf32>, vector<16x16xf32> -> vector<16x16xf32>
    %cst_5 = arith.constant 0.176776692 : f32
    %5 = vector.broadcast %cst_5 : f32 to vector<16x16xf32>
    %6 = arith.mulf %4, %5 : vector<16x16xf32>
    %c0_6 = arith.constant 0 : index
    %c0_7 = arith.constant 0 : index
    %7 = vector.load %arg3[%c0_6, %c0_7] : memref<16x16xf32, #tpu.memory_space<vmem>>, vector<16x16xf32>
    %8 = arith.addf %6, %7 : vector<16x16xf32>
    %cst_8 = arith.constant dense<0xFF800000> : vector<16xf32>
    %9 = vector.multi_reduction <maximumf>, %8, %cst_8 [1] : vector<16x16xf32> to vector<16xf32>
    %10 = vector.shape_cast %9 : vector<16xf32> to vector<16x1xf32>
    %11 = vector.broadcast %10 : vector<16x1xf32> to vector<16x16xf32>
    %12 = arith.subf %8, %11 : vector<16x16xf32>
    %13 = math.exp %12 : vector<16x16xf32>
    %cst_9 = arith.constant dense<0.000000e+00> : vector<16xf32>
    %14 = vector.multi_reduction <add>, %13, %cst_9 [1] : vector<16x16xf32> to vector<16xf32>
    %15 = vector.shape_cast %14 : vector<16xf32> to vector<16x1xf32>
    %cst_10 = arith.constant dense<0.000000e+00> : vector<16x32xf32>
    %16 = tpu.matmul %13, %3, %cst_10 {dimension_numbers = #tpu.dot_dimension_numbers<[1], [0], [0], [1], [0, 0, 1, 1], [], []>} : vector<16x16xf32>, vector<16x32xf32>, vector<16x32xf32> -> vector<16x32xf32>
    %cst_11 = arith.constant 1.000000e+00 : f32
    %17 = vector.broadcast %cst_11 : f32 to vector<16x1xf32>
    %18 = arith.divf %17, %15 : vector<16x1xf32>
    %19 = vector.broadcast %18 : vector<16x1xf32> to vector<16x32xf32>
    %20 = arith.mulf %16, %19 : vector<16x32xf32>
    %c0_12 = arith.constant 0 : index
    %c0_13 = arith.constant 0 : index
    %21 = vector.load %arg4[%c0_12, %c0_13] : memref<32x192xf32, #tpu.memory_space<vmem>>, vector<32x192xf32>
    %cst_14 = arith.constant dense<0.000000e+00> : vector<16x192xf32>
    %22 = tpu.matmul %20, %21, %cst_14 {dimension_numbers = #tpu.dot_dimension_numbers<[1], [0], [0], [1], [0, 0, 1, 1], [], []>} : vector<16x32xf32>, vector<32x192xf32>, vector<16x192xf32> -> vector<16x192xf32>
    %c0_15 = arith.constant 0 : index
    %c0_16 = arith.constant 0 : index
    %23 = vector.load %arg5[%c0_15, %c0_16] : memref<1x192xf32, #tpu.memory_space<vmem>>, vector<1x192xf32>
    %24 = vector.broadcast %23 : vector<1x192xf32> to vector<16x192xf32>
    %25 = arith.addf %22, %24 : vector<16x192xf32>
    %26 = vector.shape_cast %25 : vector<16x192xf32> to vector<2x8x192xf32>
    %c0_17 = arith.constant 0 : index
    %c0_18 = arith.constant 0 : index
    %c0_19 = arith.constant 0 : index
    %27 = vector.load %arg6[%c0_17, %c0_18, %c0_19] : memref<2x8x192xf32, #tpu.memory_space<vmem>>, vector<2x8x192xf32>
    tpu.vector_store %arg6[%c0_17, %c0_18, %c0_19], %26 {strides = array<i32>} : memref<2x8x192xf32, #tpu.memory_space<vmem>>, vector<2x8x192xf32>,
    return
  }
  func.func @transform_0(%arg0: i32) -> (i32, i32, i32) {
    %c0_i32 = arith.constant 0 : i32
    %c0_i32_0 = arith.constant 0 : i32
    %c0_i32_1 = arith.constant 0 : i32
    return %arg0, %c0_i32, %c0_i32_0 : i32, i32, i32
  }
  func.func @transform_1(%arg0: i32) -> (i32, i32, i32) {
    %c0_i32 = arith.constant 0 : i32
    %c0_i32_0 = arith.constant 0 : i32
    %c0_i32_1 = arith.constant 0 : i32
    return %arg0, %c0_i32, %c0_i32_0 : i32, i32, i32
  }
  func.func @transform_2(%arg0: i32) -> (i32, i32) {
    %c0_i32 = arith.constant 0 : i32
    %c0_i32_0 = arith.constant 0 : i32
    %c0_i32_1 = arith.constant 0 : i32
    return %c0_i32, %c0_i32_0 : i32, i32
  }
  func.func @transform_3(%arg0: i32) -> (i32, i32) {
    %c0_i32 = arith.constant 0 : i32
    %c0_i32_0 = arith.constant 0 : i32
    %c0_i32_1 = arith.constant 0 : i32
    return %c0_i32, %c0_i32_0 : i32, i32
  }
  func.func @transform_4(%arg0: i32) -> (i32, i32) {
    %c0_i32 = arith.constant 0 : i32
    %c0_i32_0 = arith.constant 0 : i32
    %c0_i32_1 = arith.constant 0 : i32
    return %c0_i32, %c0_i32_0 : i32, i32
  }
  func.func @transform_5(%arg0: i32) -> (i32, i32, i32) {
    %c0_i32 = arith.constant 0 : i32
    %c0_i32_0 = arith.constant 0 : i32
    %c0_i32_1 = arith.constant 0 : i32
    return %arg0, %c0_i32, %c0_i32_0 : i32, i32, i32
  }
}

module attributes {stable_mosaic.version = 11 : i64} {
  func.func @_adaln_kernel(%arg0: i32, %arg1: memref<2x8x32xf32, #tpu.memory_space<vmem>>, %arg2: memref<2x8x32xf32, #tpu.memory_space<vmem>>, %arg3: memref<16x16xf32, #tpu.memory_space<vmem>>, %arg4: memref<32x192xf32, #tpu.memory_space<vmem>>, %arg5: memref<1x192xf32, #tpu.memory_space<vmem>>, %arg6: memref<2x8x192xf32, #tpu.memory_space<vmem>>) attributes {dimension_semantics = [#tpu.dimension_semantics<parallel>], iteration_bounds = array<i64: 1>, scalar_prefetch = 0 : i64, scratch_operands = 0 : i64, tpu.core_type = #tpu.core_type<tc>, window_params = [{transform_indices = @transform_0, window_bounds = array<i64: 2, 8, 32>}, {transform_indices = @transform_1, window_bounds = array<i64: 2, 8, 32>}, {pipeline_mode = #tpu.pipeline_mode<synchronous>, transform_indices = @transform_2, window_bounds = array<i64: 16, 16>}, {pipeline_mode = #tpu.pipeline_mode<synchronous>, transform_indices = @transform_3, window_bounds = array<i64: 32, 192>}, {pipeline_mode = #tpu.pipeline_mode<synchronous>, transform_indices = @transform_4, window_bounds = array<i64: 1, 192>}, {transform_indices = @transform_5, window_bounds = array<i64: 2, 8, 192>}]} {
    %c0 = arith.constant 0 : index
    %c0_0 = arith.constant 0 : index
    %c0_1 = arith.constant 0 : index
    %0 = vector.load %arg1[%c0, %c0_0, %c0_1] : memref<2x8x32xf32, #tpu.memory_space<vmem>>, vector<2x8x32xf32>
    %c0_2 = arith.constant 0 : index
    %c0_3 = arith.constant 0 : index
    %c0_4 = arith.constant 0 : index
    %1 = vector.load %arg2[%c0_2, %c0_3, %c0_4] : memref<2x8x32xf32, #tpu.memory_space<vmem>>, vector<2x8x32xf32>
    %2 = vector.shape_cast %0 : vector<2x8x32xf32> to vector<16x32xf32>
    %3 = vector.shape_cast %1 : vector<2x8x32xf32> to vector<16x32xf32>
    %cst = arith.constant dense<0.000000e+00> : vector<16x16xf32>
    %4 = tpu.matmul %2, %3, %cst {dimension_numbers = #tpu.dot_dimension_numbers<[1], [1], [0], [0], [0, 0, 1, 0], [], []>} : vector<16x32xf32>, vector<16x32xf32>, vector<16x16xf32> -> vector<16x16xf32>
    %cst_5 = arith.constant 0.176776692 : f32
    %5 = vector.broadcast %cst_5 : f32 to vector<16x16xf32>
    %6 = arith.mulf %4, %5 : vector<16x16xf32>
    %c0_6 = arith.constant 0 : index
    %c0_7 = arith.constant 0 : index
    %7 = vector.load %arg3[%c0_6, %c0_7] : memref<16x16xf32, #tpu.memory_space<vmem>>, vector<16x16xf32>
    %8 = arith.addf %6, %7 : vector<16x16xf32>
    %cst_8 = arith.constant dense<0xFF800000> : vector<16xf32>
    %9 = vector.multi_reduction <maximumf>, %8, %cst_8 [1] : vector<16x16xf32> to vector<16xf32>
    %10 = vector.shape_cast %9 : vector<16xf32> to vector<16x1xf32>
    %11 = vector.broadcast %10 : vector<16x1xf32> to vector<16x16xf32>
    %12 = arith.subf %8, %11 : vector<16x16xf32>
    %13 = math.exp %12 : vector<16x16xf32>
    %cst_9 = arith.constant dense<0.000000e+00> : vector<16xf32>
    %14 = vector.multi_reduction <add>, %13, %cst_9 [1] : vector<16x16xf32> to vector<16xf32>
    %15 = vector.shape_cast %14 : vector<16xf32> to vector<16x1xf32>
    %cst_10 = arith.constant dense<0.000000e+00> : vector<16x32xf32>
    %16 = tpu.matmul %13, %3, %cst_10 {dimension_numbers = #tpu.dot_dimension_numbers<[1], [0], [0], [1], [0, 0, 1, 1], [], []>} : vector<16x16xf32>, vector<16x32xf32>, vector<16x32xf32> -> vector<16x32xf32>
    %cst_11 = arith.constant 1.000000e+00 : f32
    %17 = vector.broadcast %cst_11 : f32 to vector<16x1xf32>
    %18 = arith.divf %17, %15 : vector<16x1xf32>
    %19 = vector.broadcast %18 : vector<16x1xf32> to vector<16x32xf32>
    %20 = arith.mulf %16, %19 : vector<16x32xf32>
    %c0_12 = arith.constant 0 : index
    %c0_13 = arith.constant 0 : index
    %21 = vector.load %arg4[%c0_12, %c0_13] : memref<32x192xf32, #tpu.memory_space<vmem>>, vector<32x192xf32>
    %cst_14 = arith.constant dense<0.000000e+00> : vector<16x192xf32>
    %22 = tpu.matmul %20, %21, %cst_14 {dimension_numbers = #tpu.dot_dimension_numbers<[1], [0], [0], [1], [0, 0, 1, 1], [], []>} : vector<16x32xf32>, vector<32x192xf32>, vector<16x192xf32> -> vector<16x192xf32>
    %c0_15 = arith.constant 0 : index
    %c0_16 = arith.constant 0 : index
    %23 = vector.load %arg5[%c0_15, %c0_16] : memref<1x192xf32, #tpu.memory_space<vmem>>, vector<1x192xf32>
    %24 = vector.broadcast %23 : vector<1x192xf32> to vector<16x192xf32>
    %25 = arith.addf %22, %24 : vector<16x192xf32>
    %26 = vector.shape_cast %25 : vector<16x192xf32> to vector<2x8x192xf32>
    %c0_17 = arith.constant 0 : index
    %c0_18 = arith.constant 0 : index
    %c0_19 = arith.constant 0 : index
    %27 = vector.load %arg6[%c0_17, %c0_18, %c0_19] : memref<2x8x192xf32, #tpu.memory_space<vmem>>, vector<2x8x192xf32>
    tpu.vector_store %arg6[%c0_17, %c0_18, %c0_19], %26 {strides = array<i32>} : memref<2x8x192xf32, #tpu.memory_space<vmem>>, vector<2x8x192xf32>,
    return
  }
  func.func @transform_0(%arg0: i32) -> (i32, i32, i32) {
    %c0_i32 = arith.constant 0 : i32
    %c0_i32_0 = arith.constant 0 : i32
    %c0_i32_1 = arith.constant 0 : i32
    return %arg0, %c0_i32, %c0_i32_0 : i32, i32, i32
  }
  func.func @transform_1(%arg0: i32) -> (i32, i32, i32) {
    %c0_i32 = arith.constant 0 : i32
    %c0_i32_0 = arith.constant 0 : i32
    %c0_i32_1 = arith.constant 0 : i32
    return %arg0, %c0_i32, %c0_i32_0 : i32, i32, i32
  }
  func.func @transform_2(%arg0: i32) -> (i32, i32) {
    %c0_i32 = arith.constant 0 : i32
    %c0_i32_0 = arith.constant 0 : i32
    %c0_i32_1 = arith.constant 0 : i32
    return %c0_i32, %c0_i32_0 : i32, i32
  }
  func.func @transform_3(%arg0: i32) -> (i32, i32) {
    %c0_i32 = arith.constant 0 : i32
    %c0_i32_0 = arith.constant 0 : i32
    %c0_i32_1 = arith.constant 0 : i32
    return %c0_i32, %c0_i32_0 : i32, i32
  }
  func.func @transform_4(%arg0: i32) -> (i32, i32) {
    %c0_i32 = arith.constant 0 : i32
    %c0_i32_0 = arith.constant 0 : i32
    %c0_i32_1 = arith.constant 0 : i32
    return %c0_i32, %c0_i32_0 : i32, i32
  }
  func.func @transform_5(%arg0: i32) -> (i32, i32, i32) {
    %c0_i32 = arith.constant 0 : i32
    %c0_i32_0 = arith.constant 0 : i32
    %c0_i32_1 = arith.constant 0 : i32
    return %arg0, %c0_i32, %c0_i32_0 : i32, i32, i32
  }
}

</mosaic_0001>

<bundles_post_ra>
// kernel: adaln_forward.1
= control target key start
LH: loop header
LB: loop body
LE: loop exit
PB: predicated region body
PF: predicated region fallthrough
CT: control target
= control target key end

     0   :  { %vm24_vm0 = vcmask 261120   ;;  %vm66_vm1 = vcmask 130048   ;;  %vm213_vm10 = vcmask 523264   ;;  %s340_s1 = inlined_call_operand.vmem [shape: f32[2,8,32], index: 1, kind: input, shape index: {}]   ;;  %s341_s0 = inlined_call_operand.vmem [shape: f32[2,8,32], index: 0, kind: input, shape index: {}]   ;;  %s342_s2 = inlined_call_operand.vmem [shape: f32[16,16], index: 2, kind: input, shape index: {}]   ;;  %s343_s3 = inlined_call_operand.vmem [shape: f32[32,192], index: 3, kind: input, shape index: {}]   ;;  %s344_s4 = inlined_call_operand.vmem [shape: f32[1,192], index: 4, kind: input, shape index: {}]   ;;  %s345_s5 = inlined_call_operand.vmem [shape: f32[2,8,192], index: 5, kind: output, shape index: {}]  }
   0x1   :  { %v23_v0 = vld [vmem:[%s340_s1 + $0x8] sm:$0xff]  ;;  %v22_v1 = vld [vmem:[%s340_s1] sm:$0xff]  ;;  %v152_v24 = vld [vmem:[%s343_s3 + $0x30] sm:$0xff] }
   0x2   :  { %221 = vmatpush.xpose.msk.msra.mxu0 %vm24_vm0, %v23_v0  ;;  %105 = vmatpush.msra.mxu1 %v23_v0  ;;  %v20_v2 = vld [vmem:[%s341_s0] sm:$0xff]  ;;  %v21_v3 = vld [vmem:[%s341_s0 + $0x8] sm:$0xff]  ;;  %v153_v25 = vld [vmem:[%s343_s3 + $0x38] sm:$0xff] }
   0x3   :  { %v62_v5 = vld [vmem:[%s342_s2] sm:$0xff]  ;;  %v63_v10 = vld [vmem:[%s342_s2 + $0x8] sm:$0xff]  ;;  %178 = vmatpush.msra.mxu2 %v152_v24  ;;  %201 = vmatpush.msra.mxu3 %v153_v25  ;;  %v148_v28 = vld [vmem:[%s343_s3 + $0x10] sm:$0xff] }
   0x4   :  { %106 = vmatpush.msra.mxu1 %v22_v1  ;;  %v150_v26 = vld [vmem:[%s343_s3 + $0x20] sm:$0xff]  ;;  %v151_v27 = vld [vmem:[%s343_s3 + $0x28] sm:$0xff]  ;;  %v149_v29 = vld [vmem:[%s343_s3 + $0x18] sm:$0xff] }
   0x5   :  { %179 = vmatpush.msra.mxu2 %v150_v26  ;;  %202 = vmatpush.msra.mxu3 %v151_v27  ;;  %v146_v30 = vld [vmem:[%s343_s3] sm:$0xff]  ;;  %v147_v31 = vld [vmem:[%s343_s3 + $0x8] sm:$0xff] }
   0x6   :  { %222 = vmatpush.xpose.msk.msra.mxu0 %vm24_vm0, %v22_v1  ;;  %v154_v58 = vld [vmem:[%s344_s4] sm:$0x3] }
   0x7   :  { %180 = vmatpush.msra.mxu2 %v148_v28  ;;  %203 = vmatpush.msra.mxu3 %v149_v29  ;;  %v156_v59 = vperm.slane %v154_v58, 0  ;;  %v157_v60 = vperm.slane %v154_v58, 1 }
   0x9   :  { %223 = vmatmul.msk.f32.vlgmr.msra.gmra.mxu0 %vm24_vm0, %v20_v2  ;;  %181 = vmatpush.msra.mxu2 %v146_v30 }
   0xa   :  { %204 = vmatpush.msra.mxu3 %v147_v31 }
  0x11   :  { %224 = vmatmul.msk.f32.gmra.mxu0 %vm24_vm0, %v21_v3 }
  0x86   :  { %v54_v4 = vpop.f32.mrf.mxu0 }
  0x87   :  { %v60_v6 = vmul.f32 0.17677669, %v54_v4 }
  0x89   :  { %v64_v7 = vadd.f32 %v62_v5, %v60_v6 }
  0x8b   :  { %v67_v8 = vsel %vm66_vm1, %v64_v7, -inf }
  0x8c   :  { %68 = vmax.xlane.f32.xlu0 %v67_v8 }
  0x8e   :  { %v57_v9 = vpop.f32.mrf.mxu0 }
  0x8f   :  { %v61_v11 = vmul.f32 0.17677669, %v57_v9 }
  0x91   :  { %v65_v12 = vadd.f32 %v63_v10, %v61_v11 }
  0x93   :  { %v70_v13 = vsel %vm66_vm1, %v65_v12, -inf }
  0x94   :  { %71 = vmax.xlane.f32.xlu0 %v70_v13 }
  0xff   :  { %v69_v14 = vpop.xlane.xlu0 %68 }
 0x100   :  { %v73_v15 = vsub.f32 %v64_v7, %v69_v14 }
 0x102   :  { %v75_v16 = vmul.f32 1.442695, %v73_v15 }
 0x104   :  { %231 = vpow2.f32 %v75_v16 }
 0x107   :  { %v72_v17 = vpop.xlane.xlu0 %71 }
 0x108   :  { %v74_v18 = vsub.f32 %v65_v12, %v72_v17 }
 0x10a   :  { %v232_v19 = vpop.eup %231  ;;  %v77_v20 = vmul.f32 1.442695, %v74_v18 }
 0x10b   :  { %225 = vmatmul.msk.f32.vlgmr.msra.gmra.mxu1 %vm66_vm1, %v232_v19  ;;  %v79_v21 = vsel %vm66_vm1, %v232_v19, 0.0 }
 0x10c   :  { %233 = vpow2.f32 %v77_v20  ;;  %80 = vadd.xlane.f32.xlu1 %v79_v21 }
 0x112   :  { %v234_v22 = vpop.eup %233 }
 0x113   :  { %226 = vmatmul.msk.f32.gmra.mxu1 %vm66_vm1, %v234_v22  ;;  %v82_v23 = vsel %vm66_vm1, %v234_v22, 0.0 }
 0x114   :  { %83 = vadd.xlane.f32.xlu1 %v82_v23 }
 0x17f   :  { %v81_v32 = vpop.xlane.xlu1 %80 }
 0x180   :  { %235 = vrcp.f32 %v81_v32  ;;  %v125_v37 = vand.u32 2147483648, %v81_v32  ;;  %v123_v39 = vand.u32 2147483647, %v81_v32  ;;  %vm119_vm3 = vweird.f32 %v81_v32 }
 0x182   :  { %v126_v43 = vor.u32 1.1754944e-38, %v125_v37  ;;  %vm124_vm5 = vcmp.eq.f32.partialorder %v123_v39, 8.507059e+37 }
 0x186   :  { %v236_v33 = vpop.eup %235 }
 0x187   :  { %v115_v34 = vmul.f32 %v236_v33, %v81_v32  ;;  %v84_v35 = vpop.xlane.xlu1 %83  ;;  %vm120_vm2 = vweird.f32 %v236_v33 }
 0x188   :  { %237 = vrcp.f32 %v84_v35  ;;  %v108_v42 = vpop.f32.mrf.mxu1  ;;  %vm121_vm4 = vmor %vm119_vm3, %vm120_vm2  ;;  %v140_v49 = vand.u32 2147483648, %v84_v35  ;;  %v138_v51 = vand.u32 2147483647, %v84_v35  ;;  %vm134_vm7 = vweird.f32 %v84_v35 }
 0x189   :  { %v116_v36 = vsub.f32 1.0, %v115_v34 }
 0x18a   :  { %v141_v53 = vor.u32 1.1754944e-38, %v140_v49  ;;  %vm139_vm9 = vcmp.eq.f32.partialorder %v138_v51, 8.507059e+37 }
 0x18b   :  { %v117_v38 = vmul.f32 %v236_v33, %v116_v36 }
 0x18d   :  { %v118_v40 = vadd.f32 %v236_v33, %v117_v38 }
 0x18e   :  { %v238_v41 = vpop.eup %237 }
 0x18f   :  { %v130_v44 = vmul.f32 %v238_v41, %v84_v35  ;;  %v122_v45 = vsel %vm121_vm4, %v236_v33, %v118_v40  ;;  %vm135_vm6 = vweird.f32 %v238_v41 }
 0x190   :  { %v127_v46 = vsel %vm124_vm5, %v126_v43, %v122_v45  ;;  %vm136_vm8 = vmor %vm134_vm7, %vm135_vm6  ;;  %v111_v55 = vpop.f32.mrf.mxu1 }
 0x191   :  { %v131_v47 = vsub.f32 1.0, %v130_v44  ;;  %v144_v48 = vmul.f32 %v127_v46, %v108_v42 }
 0x193   :  { %v132_v50 = vmul.f32 %v238_v41, %v131_v47  ;;  %227 = vmatmul.msk.f32.vlgmr.msra.gmra.mxu2 %vm24_vm0, %v144_v48  ;;  %229 = vmatmul.msk.f32.vlgmr.msra.gmra.mxu3 %vm24_vm0, %v144_v48 }
 0x195   :  { %v133_v52 = vadd.f32 %v238_v41, %v132_v50 }
 0x197   :  { %v137_v54 = vsel %vm136_vm8, %v238_v41, %v133_v52 }
 0x198   :  { %v142_v56 = vsel %vm139_vm9, %v141_v53, %v137_v54 }
 0x199   :  { %v145_v57 = vmul.f32 %v142_v56, %v111_v55 }
 0x19b   :  { %228 = vmatmul.msk.f32.gmra.mxu2 %vm24_vm0, %v145_v57  ;;  %230 = vmatmul.msk.f32.gmra.mxu3 %vm24_vm0, %v145_v57 }
 0x216   :  { %v183_v61 = vpop.f32.mrf.mxu2  ;;  %v206_v62 = vpop.f32.mrf.mxu3 }
 0x217   :  { %v184_v63 = vadd.f32 %v183_v61, %v156_v59  ;;  %v207_v0 = vadd.f32 %v206_v62, %v157_v60 }
 0x219   :  { %212 = vst [vmem:[%s345_s5] sm:$0xff] %v184_v63 }
 0x21a   :  { %214 = vst.msk [vmem:[%s345_s5 + $0x8] sm:$0xff] %vm213_vm10, %v207_v0 }
 0x21e   :  { %v186_v1 = vpop.f32.mrf.mxu2  ;;  %v209_v2 = vpop.f32.mrf.mxu3 }
 0x21f   :  { %v187_v3 = vadd.f32 %v186_v1, %v156_v59  ;;  %v210_v4 = vadd.f32 %v209_v2, %v157_v60 }
 0x221   :  { %215 = vst [vmem:[%s345_s5 + $0x10] sm:$0xff] %v187_v3 }
 0x222   :  { %216 = vst.msk [vmem:[%s345_s5 + $0x18] sm:$0xff] %vm213_vm10, %v210_v4 }

// kernel: adaln_forward.1
= control target key start
LH: loop header
LB: loop body
LE: loop exit
PB: predicated region body
PF: predicated region fallthrough
CT: control target
= control target key end

     0   :  { %vm24_vm0 = vcmask 261120   ;;  %vm66_vm1 = vcmask 130048   ;;  %vm213_vm10 = vcmask 523264   ;;  %s340_s1 = inlined_call_operand.vmem [shape: f32[2,8,32], index: 1, kind: input, shape index: {}]   ;;  %s341_s0 = inlined_call_operand.vmem [shape: f32[2,8,32], index: 0, kind: input, shape index: {}]   ;;  %s342_s2 = inlined_call_operand.vmem [shape: f32[16,16], index: 2, kind: input, shape index: {}]   ;;  %s343_s3 = inlined_call_operand.vmem [shape: f32[32,192], index: 3, kind: input, shape index: {}]   ;;  %s344_s4 = inlined_call_operand.vmem [shape: f32[1,192], index: 4, kind: input, shape index: {}]   ;;  %s345_s5 = inlined_call_operand.vmem [shape: f32[2,8,192], index: 5, kind: output, shape index: {}]  }
   0x1   :  { %v23_v0 = vld [vmem:[%s340_s1 + $0x8] sm:$0xff]  ;;  %v22_v1 = vld [vmem:[%s340_s1] sm:$0xff]  ;;  %v152_v24 = vld [vmem:[%s343_s3 + $0x30] sm:$0xff] }
   0x2   :  { %221 = vmatpush.xpose.msk.msra.mxu0 %vm24_vm0, %v23_v0  ;;  %105 = vmatpush.msra.mxu1 %v23_v0  ;;  %v20_v2 = vld [vmem:[%s341_s0] sm:$0xff]  ;;  %v21_v3 = vld [vmem:[%s341_s0 + $0x8] sm:$0xff]  ;;  %v153_v25 = vld [vmem:[%s343_s3 + $0x38] sm:$0xff] }
   0x3   :  { %v62_v5 = vld [vmem:[%s342_s2] sm:$0xff]  ;;  %v63_v10 = vld [vmem:[%s342_s2 + $0x8] sm:$0xff]  ;;  %178 = vmatpush.msra.mxu2 %v152_v24  ;;  %201 = vmatpush.msra.mxu3 %v153_v25  ;;  %v148_v28 = vld [vmem:[%s343_s3 + $0x10] sm:$0xff] }
   0x4   :  { %106 = vmatpush.msra.mxu1 %v22_v1  ;;  %v150_v26 = vld [vmem:[%s343_s3 + $0x20] sm:$0xff]  ;;  %v151_v27 = vld [vmem:[%s343_s3 + $0x28] sm:$0xff]  ;;  %v149_v29 = vld [vmem:[%s343_s3 + $0x18] sm:$0xff] }
   0x5   :  { %179 = vmatpush.msra.mxu2 %v150_v26  ;;  %202 = vmatpush.msra.mxu3 %v151_v27  ;;  %v146_v30 = vld [vmem:[%s343_s3] sm:$0xff]  ;;  %v147_v31 = vld [vmem:[%s343_s3 + $0x8] sm:$0xff] }
   0x6   :  { %222 = vmatpush.xpose.msk.msra.mxu0 %vm24_vm0, %v22_v1  ;;  %v154_v58 = vld [vmem:[%s344_s4] sm:$0x3] }
   0x7   :  { %180 = vmatpush.msra.mxu2 %v148_v28  ;;  %203 = vmatpush.msra.mxu3 %v149_v29  ;;  %v156_v59 = vperm.slane %v154_v58, 0  ;;  %v157_v60 = vperm.slane %v154_v58, 1 }
   0x9   :  { %223 = vmatmul.msk.f32.vlgmr.msra.gmra.mxu0 %vm24_vm0, %v20_v2  ;;  %181 = vmatpush.msra.mxu2 %v146_v30 }
   0xa   :  { %204 = vmatpush.msra.mxu3 %v147_v31 }
  0x11   :  { %224 = vmatmul.msk.f32.gmra.mxu0 %vm24_vm0, %v21_v3 }
  0x86   :  { %v54_v4 = vpop.f32.mrf.mxu0 }
  0x87   :  { %v60_v6 = vmul.f32 0.17677669, %v54_v4 }
  0x89   :  { %v64_v7 = vadd.f32 %v62_v5, %v60_v6 }
  0x8b   :  { %v67_v8 = vsel %vm66_vm1, %v64_v7, -inf }
  0x8c   :  { %68 = vmax.xlane.f32.xlu0 %v67_v8 }
  0x8e   :  { %v57_v9 = vpop.f32.mrf.mxu0 }
  0x8f   :  { %v61_v11 = vmul.f32 0.17677669, %v57_v9 }
  0x91   :  { %v65_v12 = vadd.f32 %v63_v10, %v61_v11 }
  0x93   :  { %v70_v13 = vsel %vm66_vm1, %v65_v12, -inf }
  0x94   :  { %71 = vmax.xlane.f32.xlu0 %v70_v13 }
  0xff   :  { %v69_v14 = vpop.xlane.xlu0 %68 }
 0x100   :  { %v73_v15 = vsub.f32 %v64_v7, %v69_v14 }
 0x102   :  { %v75_v16 = vmul.f32 1.442695, %v73_v15 }
 0x104   :  { %231 = vpow2.f32 %v75_v16 }
 0x107   :  { %v72_v17 = vpop.xlane.xlu0 %71 }
 0x108   :  { %v74_v18 = vsub.f32 %v65_v12, %v72_v17 }
 0x10a   :  { %v232_v19 = vpop.eup %231  ;;  %v77_v20 = vmul.f32 1.442695, %v74_v18 }
 0x10b   :  { %225 = vmatmul.msk.f32.vlgmr.msra.gmra.mxu1 %vm66_vm1, %v232_v19  ;;  %v79_v21 = vsel %vm66_vm1, %v232_v19, 0.0 }
 0x10c   :  { %233 = vpow2.f32 %v77_v20  ;;  %80 = vadd.xlane.f32.xlu1 %v79_v21 }
 0x112   :  { %v234_v22 = vpop.eup %233 }
 0x113   :  { %226 = vmatmul.msk.f32.gmra.mxu1 %vm66_vm1, %v234_v22  ;;  %v82_v23 = vsel %vm66_vm1, %v234_v22, 0.0 }
 0x114   :  { %83 = vadd.xlane.f32.xlu1 %v82_v23 }
 0x17f   :  { %v81_v32 = vpop.xlane.xlu1 %80 }
 0x180   :  { %235 = vrcp.f32 %v81_v32  ;;  %v125_v37 = vand.u32 2147483648, %v81_v32  ;;  %v123_v39 = vand.u32 2147483647, %v81_v32  ;;  %vm119_vm3 = vweird.f32 %v81_v32 }
 0x182   :  { %v126_v43 = vor.u32 1.1754944e-38, %v125_v37  ;;  %vm124_vm5 = vcmp.eq.f32.partialorder %v123_v39, 8.507059e+37 }
 0x186   :  { %v236_v33 = vpop.eup %235 }
 0x187   :  { %v115_v34 = vmul.f32 %v236_v33, %v81_v32  ;;  %v84_v35 = vpop.xlane.xlu1 %83  ;;  %vm120_vm2 = vweird.f32 %v236_v33 }
 0x188   :  { %237 = vrcp.f32 %v84_v35  ;;  %v108_v42 = vpop.f32.mrf.mxu1  ;;  %vm121_vm4 = vmor %vm119_vm3, %vm120_vm2  ;;  %v140_v49 = vand.u32 2147483648, %v84_v35  ;;  %v138_v51 = vand.u32 2147483647, %v84_v35  ;;  %vm134_vm7 = vweird.f32 %v84_v35 }
 0x189   :  { %v116_v36 = vsub.f32 1.0, %v115_v34 }
 0x18a   :  { %v141_v53 = vor.u32 1.1754944e-38, %v140_v49  ;;  %vm139_vm9 = vcmp.eq.f32.partialorder %v138_v51, 8.507059e+37 }
 0x18b   :  { %v117_v38 = vmul.f32 %v236_v33, %v116_v36 }
 0x18d   :  { %v118_v40 = vadd.f32 %v236_v33, %v117_v38 }
 0x18e   :  { %v238_v41 = vpop.eup %237 }
 0x18f   :  { %v130_v44 = vmul.f32 %v238_v41, %v84_v35  ;;  %v122_v45 = vsel %vm121_vm4, %v236_v33, %v118_v40  ;;  %vm135_vm6 = vweird.f32 %v238_v41 }
 0x190   :  { %v127_v46 = vsel %vm124_vm5, %v126_v43, %v122_v45  ;;  %vm136_vm8 = vmor %vm134_vm7, %vm135_vm6  ;;  %v111_v55 = vpop.f32.mrf.mxu1 }
 0x191   :  { %v131_v47 = vsub.f32 1.0, %v130_v44  ;;  %v144_v48 = vmul.f32 %v127_v46, %v108_v42 }
 0x193   :  { %v132_v50 = vmul.f32 %v238_v41, %v131_v47  ;;  %227 = vmatmul.msk.f32.vlgmr.msra.gmra.mxu2 %vm24_vm0, %v144_v48  ;;  %229 = vmatmul.msk.f32.vlgmr.msra.gmra.mxu3 %vm24_vm0, %v144_v48 }
 0x195   :  { %v133_v52 = vadd.f32 %v238_v41, %v132_v50 }
 0x197   :  { %v137_v54 = vsel %vm136_vm8, %v238_v41, %v133_v52 }
 0x198   :  { %v142_v56 = vsel %vm139_vm9, %v141_v53, %v137_v54 }
 0x199   :  { %v145_v57 = vmul.f32 %v142_v56, %v111_v55 }
 0x19b   :  { %228 = vmatmul.msk.f32.gmra.mxu2 %vm24_vm0, %v145_v57  ;;  %230 = vmatmul.msk.f32.gmra.mxu3 %vm24_vm0, %v145_v57 }
 0x216   :  { %v183_v61 = vpop.f32.mrf.mxu2  ;;  %v206_v62 = vpop.f32.mrf.mxu3 }
 0x217   :  { %v184_v63 = vadd.f32 %v183_v61, %v156_v59  ;;  %v207_v0 = vadd.f32 %v206_v62, %v157_v60 }
 0x219   :  { %212 = vst [vmem:[%s345_s5] sm:$0xff] %v184_v63 }
 0x21a   :  { %214 = vst.msk [vmem:[%s345_s5 + $0x8] sm:$0xff] %vm213_vm10, %v207_v0 }
 0x21e   :  { %v186_v1 = vpop.f32.mrf.mxu2  ;;  %v209_v2 = vpop.f32.mrf.mxu3 }
 0x21f   :  { %v187_v3 = vadd.f32 %v186_v1, %v156_v59  ;;  %v210_v4 = vadd.f32 %v209_v2, %v157_v60 }
 0x221   :  { %215 = vst [vmem:[%s345_s5 + $0x10] sm:$0xff] %v187_v3 }
 0x222   :  { %216 = vst.msk [vmem:[%s345_s5 + $0x18] sm:$0xff] %vm213_vm10, %v210_v4 }

</bundles_post_ra>
